<compile_context>
chip_gen: v7x
topology: tpu7x:2x2x1
jax: 0.10.0
libtpu: 0.0.40
codegen_flags: <defaults>
</compile_context>

<pallas_src>
import functools

import jax
import jax.numpy as jnp
from jax import lax
from jax.experimental import pallas as pl
from jax.experimental.pallas import tpu as pltpu

NEG_BIG = -1e30  # stand-in for float('-inf') in the masked softmax


# ----------------------------- kernel helpers ------------------------------ #
def _leaky_relu(x, slope=0.2):
    return jnp.where(x >= 0, x, slope * x)


def _elu(x):
    return jnp.where(x > 0, x, jnp.exp(x) - 1.0)


def _masked_softmax(logits, mask):
    logits = jnp.where(mask > 0, logits, NEG_BIG)
    m = jnp.max(logits, axis=-1, keepdims=True)
    e = jnp.exp(logits - m)
    s = jnp.sum(e, axis=-1, keepdims=True)
    return e * pl.reciprocal(s, approx=True)


# --------------------------------- kernel ---------------------------------- #
def match_hgat_kernel(
    emb_ref, adj_ref, vt_ref,
    w1_ref, w2_ref,
    fc1w_ref, fc2w_ref, fc3w_ref, fcb_ref,
    out_ref,
    *, tb, n, n_type, n_head, f1, f2,
):
    m_rows = tb * n
    h = emb_ref[0]           # (M, F_in)     M = tb * n rows (tb graphs)
    bd_adj = adj_ref[0]      # (M, M)        block-diagonal adjacency
    vt = vt_ref[0]           # (M, T)        one-hot node types
    ones_col = jnp.ones((m_rows, 1), jnp.float32)

    # ---- layer 1: n_head heterogeneous heads, ONE fused MXU pass ----
    # x_aug folds the one-hot type selection into the matmul input; the trailing
    # ones column picks up the bias row of the packed weight stack.
    x_aug = jnp.concatenate(
        [vt[:, t:t + 1] * h for t in range(n_type)] + [ones_col], axis=-1)
    hp_aug = jnp.dot(x_aug, w1_ref[...], preferred_element_type=jnp.float32)
    hf = n_head * f1
    hp_cat = hp_aug[:, :hf]                         # head-major projections (+bias)
    att_src = hp_aug[:, hf:hf + n_head]             # (M, H)
    att_dst = hp_aug[:, hf + n_head:hf + 2 * n_head]

    head_outs = []
    for hd in range(n_head):
        src = att_src[:, hd:hd + 1]                 # (M, 1)
        dst = att_dst[:, hd:hd + 1]                 # (M, 1)
        logits = _leaky_relu(src + jnp.transpose(dst))      # (M, M)
        p = _masked_softmax(logits, bd_adj)
        head_outs.append(
            jnp.dot(p, hp_cat[:, hd * f1:(hd + 1) * f1],
                    preferred_element_type=jnp.float32))
    x1 = _elu(jnp.concatenate(head_outs, axis=-1))  # (M, H*F1), heads concat'd
    # F.dropout(training=False) -> identity

    # ---- layer 2: single-head output attention, same fused structure ----
    x2_aug = jnp.concatenate(
        [vt[:, t:t + 1] * x1 for t in range(n_type)] + [ones_col], axis=-1)
    hp2 = jnp.dot(x2_aug, w2_ref[...], preferred_element_type=jnp.float32)
    hp2_proj = hp2[:, :f2]
    logits2 = _leaky_relu(hp2[:, f2:f2 + 1] + jnp.transpose(hp2[:, f2 + 1:f2 + 2]))
    p2 = _masked_softmax(logits2, bd_adj)
    x2 = _elu(jnp.dot(p2, hp2_proj, preferred_element_type=jnp.float32))  # (M, F2)

    # ---- matching head, batched over the tb graphs of this grid step ----
    row_ids = lax.broadcasted_iota(jnp.int32, (tb, m_rows), 1)
    g_ids = lax.broadcasted_iota(jnp.int32, (tb, m_rows), 0)
    s_left = (row_ids == g_ids * n).astype(jnp.float32)          # node 0 of each graph
    s_right = (row_ids == g_ids * n + 1).astype(jnp.float32)     # node 1 of each graph
    left = jnp.dot(s_left, x2, preferred_element_type=jnp.float32)    # (tb, F2)
    right = jnp.dot(s_right, x2, preferred_element_type=jnp.float32)  # (tb, F2)

    fcb = fcb_ref[...]
    b_fc1 = fcb[:, :3 * f2]
    b_fc2 = fcb[:, 3 * f2:4 * f2]
    b_fc3 = fcb[:, 4 * f2:4 * f2 + 2]

    v = left * right
    v = jnp.maximum(
        jnp.dot(v, fc1w_ref[...], preferred_element_type=jnp.float32) + b_fc1, 0.0)
    v = jnp.maximum(
        jnp.dot(v, fc2w_ref[...], preferred_element_type=jnp.float32) + b_fc2, 0.0)
    scores = jnp.dot(v, fc3w_ref[...], preferred_element_type=jnp.float32) + b_fc3
    mx = jnp.max(scores, axis=-1, keepdims=True)
    lse = mx + jnp.log(jnp.sum(jnp.exp(scores - mx), axis=-1, keepdims=True))
    out_ref[...] = (scores - lse).reshape(out_ref.shape)


# ----------------------------- host-side packing ---------------------------- #
def _pack_gat_weights(w, a_src, a_dst, bias):
    """w: (T, H, F_in, F_out); a_*: (H, F_out); bias: (1, F_out).

    Returns (T*F_in + 1, H*F_out + 2H):
      rows = type-stacked input (+ trailing bias row for the ones column)
      cols = [head-major projections | per-head W@a_src | per-head W@a_dst]
    Bias is folded via the row-stochastic softmax identity P @ (hp+b) = P@hp + b.
    """
    t, h_, fi, fo = w.shape
    w_proj = jnp.transpose(w, (0, 2, 1, 3)).reshape(t * fi, h_ * fo)
    src_cols = jnp.einsum("thio,ho->tih", w, a_src).reshape(t * fi, h_)
    dst_cols = jnp.einsum("thio,ho->tih", w, a_dst).reshape(t * fi, h_)
    top = jnp.concatenate([w_proj, src_cols, dst_cols], axis=-1)
    bias_row = jnp.concatenate(
        [jnp.tile(bias, (1, h_)), jnp.zeros((1, 2 * h_), w.dtype)], axis=-1)
    return jnp.concatenate([top, bias_row], axis=0)


def _choose_tb(bs, max_tb=8):
    """Largest divisor of bs <= max_tb that still leaves a grid of >= 2 steps
    (keeps a parallel axis for v7x's two TensorCores)."""
    best = 1
    for t in range(1, min(max_tb, bs) + 1):
        if bs % t == 0 and bs // t >= 2:
            best = t
    return best


# -------------------------------- wrapper ---------------------------------- #
def match_batch_hgat(emb, adj, v_types, params, tb=None):
    bs, n, f_in = emb.shape
    n_type = v_types.shape[-1]
    n_head, f1 = params["a_src1"].shape
    f2 = params["w2"].shape[-1]
    if tb is None:
        tb = _choose_tb(bs)
    assert bs % tb == 0, "batch must be divisible by the per-step graph tile"
    grid = bs // tb
    m_rows = tb * n

    # TODO(synk): bf16 MXU operands (v6e/v7x) skipped at these tiny, latency-bound
    # shapes; activations stay f32 everywhere (also the right choice on v5e).
    w1_stack = _pack_gat_weights(
        params["w1"], params["a_src1"], params["a_dst1"], params["b1"])
    w2_stack = _pack_gat_weights(
        params["w2"], params["a_src2"], params["a_dst2"], params["b2"])
    fcb = jnp.concatenate(
        [params["fc1_b"], params["fc2_b"], params["fc3_b"]], axis=-1)

    # tb graphs per grid step: flatten nodes, build block-diagonal adjacency.
    emb3 = emb.reshape(grid, m_rows, f_in)
    vt3 = v_types.reshape(grid, m_rows, n_type)
    adj_g = adj.reshape(grid, tb, n, n)
    eye_tb = jnp.eye(tb, dtype=adj.dtype)
    bd3 = adj_g[:, :, None, :, :] * eye_tb[None, :, :, None, None]
    bd3 = jnp.transpose(bd3, (0, 1, 3, 2, 4)).reshape(grid, m_rows, m_rows)

    kernel = functools.partial(
        match_hgat_kernel, tb=tb, n=n, n_type=n_type, n_head=n_head, f1=f1, f2=f2)

    def rep2(arr):   # weight stays VMEM-resident across grid steps (constant map)
        return pl.BlockSpec(arr.shape, lambda b: (0, 0))

    in_specs = [
        pl.BlockSpec((1, m_rows, f_in), lambda b: (b, 0, 0)),
        pl.BlockSpec((1, m_rows, m_rows), lambda b: (b, 0, 0)),
        pl.BlockSpec((1, m_rows, n_type), lambda b: (b, 0, 0)),
        rep2(w1_stack), rep2(w2_stack),
        rep2(params["fc1_w"]), rep2(params["fc2_w"]), rep2(params["fc3_w"]),
        rep2(fcb),
    ]

    out = pl.pallas_call(
        kernel,
        out_shape=jax.ShapeDtypeStruct((grid, tb, 2), jnp.float32),
        grid=(grid,),
        in_specs=in_specs,
        out_specs=pl.BlockSpec((1, tb, 2), lambda b: (b, 0, 0)),
        compiler_params=pltpu.CompilerParams(dimension_semantics=("parallel",)),
    )(emb3, bd3, vt3, w1_stack, w2_stack,
      params["fc1_w"], params["fc2_w"], params["fc3_w"], fcb)
    return out.reshape(bs, 2)


# ----------------------- pure-JAX reference (checking) ---------------------- #
def _ref_gat(h, adj, vt, W, a_src, a_dst, bias):
    w_node = jnp.einsum("bnt,thio->bnhio", vt, W)
    hp = jnp.einsum("bni,bnhio->bhno", h, w_node)                       # (B,H,N,Fo)
    asrc = jnp.einsum("bhno,ho->bhn", hp, a_src)[:, :, :, None]
    adst = jnp.einsum("bhno,ho->bhn", hp, a_dst)[:, :, None, :]
    logits = jnp.where((asrc + adst) >= 0, asrc + adst, 0.2 * (asrc + adst))
    logits = jnp.where(adj[:, None] > 0, logits, NEG_BIG)
    p = jax.nn.softmax(logits, axis=-1)
    return jnp.einsum("bhnm,bhmo->bhno", p, hp) + bias


def match_batch_hgat_ref(emb, adj, v_types, params):
    bs, n, _ = emb.shape
    x = _ref_gat(emb, adj, v_types, params["w1"], params["a_src1"],
                 params["a_dst1"], params["b1"])                        # (B,H,N,F1)
    x = jnp.transpose(x, (0, 2, 1, 3)).reshape(bs, n, -1)
    x = jnp.where(x > 0, x, jnp.exp(x) - 1.0)
    x = _ref_gat(x, adj, v_types, params["w2"], params["a_src2"],
                 params["a_dst2"], params["b2"])[:, 0]                  # (B,N,F2)
    x = jnp.where(x > 0, x, jnp.exp(x) - 1.0)
    v = x[:, 0, :] * x[:, 1, :]
    v = jnp.maximum(v @ params["fc1_w"] + params["fc1_b"], 0.0)
    v = jnp.maximum(v @ params["fc2_w"] + params["fc2_b"], 0.0)
    scores = v @ params["fc3_w"] + params["fc3_b"]
    return jax.nn.log_softmax(scores, axis=1)


# --------------------------------- main ------------------------------------ #
if __name__ == "__main__":
    # Small config consistent with the module: n_units=[32, 8, 8], n_head=4,
    # n_type_nodes=3, batch=2, nodes=8.
    bs, n, f_in, f1, n_head, n_type = 2, 8, 32, 8, 4, 3
    d_hidden = 8                        # n_units[-1]
    f_in2 = n_head * f1                 # input dim of out_att

    key = jax.random.PRNGKey(0)
    ks = jax.random.split(key, 16)

    emb = jax.random.normal(ks[0], (bs, n, f_in), jnp.float32)
    adj = (jax.random.uniform(ks[1], (bs, n, n)) > 0.4).astype(jnp.float32)
    adj = jnp.maximum(adj, jnp.transpose(adj, (0, 2, 1)))
    adj = jnp.maximum(adj, jnp.eye(n, dtype=jnp.float32)[None])          # self loops
    types = jax.random.randint(ks[2], (bs, n), 0, n_type)
    v_types = jax.nn.one_hot(types, n_type, dtype=jnp.float32)

    s = 0.1
    params = {
        "w1": s * jax.random.normal(ks[3], (n_type, n_head, f_in, f1), jnp.float32),
        "a_src1": s * jax.random.normal(ks[4], (n_head, f1), jnp.float32),
        "a_dst1": s * jax.random.normal(ks[5], (n_head, f1), jnp.float32),
        "b1": jnp.zeros((1, f1), jnp.float32),
        "w2": s * jax.random.normal(ks[6], (n_type, 1, f_in2, d_hidden), jnp.float32),
        "a_src2": s * jax.random.normal(ks[7], (1, d_hidden), jnp.float32),
        "a_dst2": s * jax.random.normal(ks[8], (1, d_hidden), jnp.float32),
        "b2": jnp.zeros((1, d_hidden), jnp.float32),
        "fc1_w": s * jax.random.normal(ks[9], (d_hidden, 3 * d_hidden), jnp.float32),
        "fc1_b": s * jax.random.normal(ks[10], (1, 3 * d_hidden), jnp.float32),
        "fc2_w": s * jax.random.normal(ks[11], (3 * d_hidden, d_hidden), jnp.float32),
        "fc2_b": s * jax.random.normal(ks[12], (1, d_hidden), jnp.float32),
        "fc3_w": s * jax.random.normal(ks[13], (d_hidden, 2), jnp.float32),
        "fc3_b": s * jax.random.normal(ks[14], (1, 2), jnp.float32),
    }

    out = jax.block_until_ready(match_batch_hgat(emb, adj, v_types, params))
    ref = jax.block_until_ready(match_batch_hgat_ref(emb, adj, v_types, params))

    assert out.shape == (bs, 2)
    assert bool(jnp.all(jnp.isfinite(out)))
    assert bool(jnp.allclose(out, ref, atol=1e-2, rtol=1e-2)), (out, ref)

    # TODO(synk): dropout / InstanceNorm1d are inference-time no-ops here
    # (training=False, instance_normalization=False) and are not implemented.
    print("KERNEL_OK")
</pallas_src>

<mosaic_0001>
module attributes {stable_mosaic.version = 11 : i64} {
  func.func @match_hgat_kernel(%arg0: i32, %arg1: memref<1x8x32xf32, #tpu.memory_space<vmem>>, %arg2: memref<1x8x8xf32, #tpu.memory_space<vmem>>, %arg3: memref<1x8x3xf32, #tpu.memory_space<vmem>>, %arg4: memref<97x40xf32, #tpu.memory_space<vmem>>, %arg5: memref<97x10xf32, #tpu.memory_space<vmem>>, %arg6: memref<8x24xf32, #tpu.memory_space<vmem>>, %arg7: memref<24x8xf32, #tpu.memory_space<vmem>>, %arg8: memref<8x2xf32, #tpu.memory_space<vmem>>, %arg9: memref<1x34xf32, #tpu.memory_space<vmem>>, %arg10: memref<1x1x2xf32, #tpu.memory_space<vmem>>) attributes {dimension_semantics = [#tpu.dimension_semantics<parallel>], iteration_bounds = array<i64: 2>, scalar_prefetch = 0 : i64, scratch_operands = 0 : i64, tpu.core_type = #tpu.core_type<tc>, window_params = [{transform_indices = @transform_0, window_bounds = array<i64: 1, 8, 32>}, {transform_indices = @transform_1, window_bounds = array<i64: 1, 8, 8>}, {transform_indices = @transform_2, window_bounds = array<i64: 1, 8, 3>}, {pipeline_mode = #tpu.pipeline_mode<synchronous>, transform_indices = @transform_3, window_bounds = array<i64: 97, 40>}, {pipeline_mode = #tpu.pipeline_mode<synchronous>, transform_indices = @transform_4, window_bounds = array<i64: 97, 10>}, {pipeline_mode = #tpu.pipeline_mode<synchronous>, transform_indices = @transform_5, window_bounds = array<i64: 8, 24>}, {pipeline_mode = #tpu.pipeline_mode<synchronous>, transform_indices = @transform_6, window_bounds = array<i64: 24, 8>}, {pipeline_mode = #tpu.pipeline_mode<synchronous>, transform_indices = @transform_7, window_bounds = array<i64: 8, 2>}, {pipeline_mode = #tpu.pipeline_mode<synchronous>, transform_indices = @transform_8, window_bounds = array<i64: 1, 34>}, {transform_indices = @transform_9, window_bounds = array<i64: 1, 1, 2>}]} {
    %c0 = arith.constant 0 : index
    %c0_0 = arith.constant 0 : index
    %c0_1 = arith.constant 0 : index
    %0 = vector.load %arg1[%c0, %c0_0, %c0_1] : memref<1x8x32xf32, #tpu.memory_space<vmem>>, vector<1x8x32xf32>
    %1 = vector.shape_cast %0 : vector<1x8x32xf32> to vector<8x32xf32>
    %c0_2 = arith.constant 0 : index
    %c0_3 = arith.constant 0 : index
    %c0_4 = arith.constant 0 : index
    %2 = vector.load %arg2[%c0_2, %c0_3, %c0_4] : memref<1x8x8xf32, #tpu.memory_space<vmem>>, vector<1x8x8xf32>
    %3 = vector.shape_cast %2 : vector<1x8x8xf32> to vector<8x8xf32>
    %c0_5 = arith.constant 0 : index
    %c0_6 = arith.constant 0 : index
    %c0_7 = arith.constant 0 : index
    %4 = vector.load %arg3[%c0_5, %c0_6, %c0_7] : memref<1x8x3xf32, #tpu.memory_space<vmem>>, vector<1x8x3xf32>
    %5 = vector.shape_cast %4 : vector<1x8x3xf32> to vector<8x3xf32>
    %cst = arith.constant 1.000000e+00 : f32
    %6 = vector.broadcast %cst : f32 to vector<8x1xf32>
    %7 = vector.extract_strided_slice %5 {offsets = [0, 0], sizes = [8, 1], strides = [1, 1]} : vector<8x3xf32> to vector<8x1xf32>
    %8 = vector.broadcast %7 : vector<8x1xf32> to vector<8x32xf32>
    %9 = arith.mulf %8, %1 : vector<8x32xf32>
    %10 = vector.extract_strided_slice %5 {offsets = [0, 1], sizes = [8, 1], strides = [1, 1]} : vector<8x3xf32> to vector<8x1xf32>
    %11 = vector.broadcast %10 : vector<8x1xf32> to vector<8x32xf32>
    %12 = arith.mulf %11, %1 : vector<8x32xf32>
    %13 = vector.extract_strided_slice %5 {offsets = [0, 2], sizes = [8, 1], strides = [1, 1]} : vector<8x3xf32> to vector<8x1xf32>
    %14 = vector.broadcast %13 : vector<8x1xf32> to vector<8x32xf32>
    %15 = arith.mulf %14, %1 : vector<8x32xf32>
    %16 = tpu.concatenate %9, %12, %15, %6 in 1 : vector<8x32xf32>, vector<8x32xf32>, vector<8x32xf32>, vector<8x1xf32> -> vector<8x97xf32>
    %c0_8 = arith.constant 0 : index
    %c0_9 = arith.constant 0 : index
    %17 = vector.load %arg4[%c0_8, %c0_9] : memref<97x40xf32, #tpu.memory_space<vmem>>, vector<97x40xf32>
    %cst_10 = arith.constant dense<0.000000e+00> : vector<8x40xf32>
    %18 = tpu.matmul %16, %17, %cst_10 {dimension_numbers = #tpu.dot_dimension_numbers<[1], [0], [0], [1], [0, 0, 1, 1], [], []>} : vector<8x97xf32>, vector<97x40xf32>, vector<8x40xf32> -> vector<8x40xf32>
    %19 = vector.extract_strided_slice %18 {offsets = [0, 0], sizes = [8, 32], strides = [1, 1]} : vector<8x40xf32> to vector<8x32xf32>
    %20 = vector.extract_strided_slice %18 {offsets = [0, 32], sizes = [8, 4], strides = [1, 1]} : vector<8x40xf32> to vector<8x4xf32>
    %21 = vector.extract_strided_slice %18 {offsets = [0, 36], sizes = [8, 4], strides = [1, 1]} : vector<8x40xf32> to vector<8x4xf32>
    %22 = vector.extract_strided_slice %20 {offsets = [0, 0], sizes = [8, 1], strides = [1, 1]} : vector<8x4xf32> to vector<8x1xf32>
    %23 = vector.extract_strided_slice %21 {offsets = [0, 0], sizes = [8, 1], strides = [1, 1]} : vector<8x4xf32> to vector<8x1xf32>
    %24 = tpu.transpose %23, [1, 0] : vector<8x1xf32> -> vector<1x8xf32>
    %25 = vector.broadcast %22 : vector<8x1xf32> to vector<8x8xf32>
    %26 = vector.broadcast %24 : vector<1x8xf32> to vector<8x8xf32>
    %27 = arith.addf %25, %26 : vector<8x8xf32>
    %cst_11 = arith.constant 0.000000e+00 : f32
    %28 = vector.broadcast %cst_11 : f32 to vector<8x8xf32>
    %29 = arith.cmpf oge, %27, %28 : vector<8x8xf32>
    %cst_12 = arith.constant 2.000000e-01 : f32
    %30 = vector.broadcast %cst_12 : f32 to vector<8x8xf32>
    %31 = arith.mulf %30, %27 : vector<8x8xf32>
    %32 = arith.select %29, %27, %31 : vector<8x8xi1>, vector<8x8xf32>
    %cst_13 = arith.constant 0.000000e+00 : f32
    %33 = vector.broadcast %cst_13 : f32 to vector<8x8xf32>
    %34 = arith.cmpf ogt, %3, %33 : vector<8x8xf32>
    %cst_14 = arith.constant -1.000000e+30 : f32
    %35 = vector.broadcast %cst_14 : f32 to vector<8x8xf32>
    %36 = arith.select %34, %32, %35 : vector<8x8xi1>, vector<8x8xf32>
    %cst_15 = arith.constant dense<0xFF800000> : vector<8xf32>
    %37 = vector.multi_reduction <maximumf>, %36, %cst_15 [1] : vector<8x8xf32> to vector<8xf32>
    %38 = vector.shape_cast %37 : vector<8xf32> to vector<8x1xf32>
    %39 = vector.broadcast %38 : vector<8x1xf32> to vector<8x8xf32>
    %40 = arith.subf %36, %39 : vector<8x8xf32>
    %41 = math.exp %40 : vector<8x8xf32>
    %cst_16 = arith.constant dense<0.000000e+00> : vector<8xf32>
    %42 = vector.multi_reduction <add>, %41, %cst_16 [1] : vector<8x8xf32> to vector<8xf32>
    %43 = vector.shape_cast %42 : vector<8xf32> to vector<8x1xf32>
    %44 = tpu.reciprocal %43 {approx = true} : vector<8x1xf32> -> vector<8x1xf32>
    %45 = vector.broadcast %44 : vector<8x1xf32> to vector<8x8xf32>
    %46 = arith.mulf %41, %45 : vector<8x8xf32>
    %47 = vector.extract_strided_slice %19 {offsets = [0, 0], sizes = [8, 8], strides = [1, 1]} : vector<8x32xf32> to vector<8x8xf32>
    %cst_17 = arith.constant dense<0.000000e+00> : vector<8x8xf32>
    %48 = tpu.matmul %46, %47, %cst_17 {dimension_numbers = #tpu.dot_dimension_numbers<[1], [0], [0], [1], [0, 0, 1, 1], [], []>} : vector<8x8xf32>, vector<8x8xf32>, vector<8x8xf32> -> vector<8x8xf32>
    %49 = vector.extract_strided_slice %20 {offsets = [0, 1], sizes = [8, 1], strides = [1, 1]} : vector<8x4xf32> to vector<8x1xf32>
    %50 = vector.extract_strided_slice %21 {offsets = [0, 1], sizes = [8, 1], strides = [1, 1]} : vector<8x4xf32> to vector<8x1xf32>
    %51 = tpu.transpose %50, [1, 0] : vector<8x1xf32> -> vector<1x8xf32>
    %52 = vector.broadcast %49 : vector<8x1xf32> to vector<8x8xf32>
    %53 = vector.broadcast %51 : vector<1x8xf32> to vector<8x8xf32>
    %54 = arith.addf %52, %53 : vector<8x8xf32>
    %cst_18 = arith.constant 0.000000e+00 : f32
    %55 = vector.broadcast %cst_18 : f32 to vector<8x8xf32>
    %56 = arith.cmpf oge, %54, %55 : vector<8x8xf32>
    %cst_19 = arith.constant 2.000000e-01 : f32
    %57 = vector.broadcast %cst_19 : f32 to vector<8x8xf32>
    %58 = arith.mulf %57, %54 : vector<8x8xf32>
    %59 = arith.select %56, %54, %58 : vector<8x8xi1>, vector<8x8xf32>
    %cst_20 = arith.constant 0.000000e+00 : f32
    %60 = vector.broadcast %cst_20 : f32 to vector<8x8xf32>
    %61 = arith.cmpf ogt, %3, %60 : vector<8x8xf32>
    %cst_21 = arith.constant -1.000000e+30 : f32
    %62 = vector.broadcast %cst_21 : f32 to vector<8x8xf32>
    %63 = arith.select %61, %59, %62 : vector<8x8xi1>, vector<8x8xf32>
    %cst_22 = arith.constant dense<0xFF800000> : vector<8xf32>
    %64 = vector.multi_reduction <maximumf>, %63, %cst_22 [1] : vector<8x8xf32> to vector<8xf32>
    %65 = vector.shape_cast %64 : vector<8xf32> to vector<8x1xf32>
    %66 = vector.broadcast %65 : vector<8x1xf32> to vector<8x8xf32>
    %67 = arith.subf %63, %66 : vector<8x8xf32>
    %68 = math.exp %67 : vector<8x8xf32>
    %cst_23 = arith.constant dense<0.000000e+00> : vector<8xf32>
    %69 = vector.multi_reduction <add>, %68, %cst_23 [1] : vector<8x8xf32> to vector<8xf32>
    %70 = vector.shape_cast %69 : vector<8xf32> to vector<8x1xf32>
    %71 = tpu.reciprocal %70 {approx = true} : vector<8x1xf32> -> vector<8x1xf32>
    %72 = vector.broadcast %71 : vector<8x1xf32> to vector<8x8xf32>
    %73 = arith.mulf %68, %72 : vector<8x8xf32>
    %74 = vector.extract_strided_slice %19 {offsets = [0, 8], sizes = [8, 8], strides = [1, 1]} : vector<8x32xf32> to vector<8x8xf32>
    %cst_24 = arith.constant dense<0.000000e+00> : vector<8x8xf32>
    %75 = tpu.matmul %73, %74, %cst_24 {dimension_numbers = #tpu.dot_dimension_numbers<[1], [0], [0], [1], [0, 0, 1, 1], [], []>} : vector<8x8xf32>, vector<8x8xf32>, vector<8x8xf32> -> vector<8x8xf32>
    %76 = vector.extract_strided_slice %20 {offsets = [0, 2], sizes = [8, 1], strides = [1, 1]} : vector<8x4xf32> to vector<8x1xf32>
    %77 = vector.extract_strided_slice %21 {offsets = [0, 2], sizes = [8, 1], strides = [1, 1]} : vector<8x4xf32> to vector<8x1xf32>
    %78 = tpu.transpose %77, [1, 0] : vector<8x1xf32> -> vector<1x8xf32>
    %79 = vector.broadcast %76 : vector<8x1xf32> to vector<8x8xf32>
    %80 = vector.broadcast %78 : vector<1x8xf32> to vector<8x8xf32>
    %81 = arith.addf %79, %80 : vector<8x8xf32>
    %cst_25 = arith.constant 0.000000e+00 : f32
    %82 = vector.broadcast %cst_25 : f32 to vector<8x8xf32>
    %83 = arith.cmpf oge, %81, %82 : vector<8x8xf32>
    %cst_26 = arith.constant 2.000000e-01 : f32
    %84 = vector.broadcast %cst_26 : f32 to vector<8x8xf32>
    %85 = arith.mulf %84, %81 : vector<8x8xf32>
    %86 = arith.select %83, %81, %85 : vector<8x8xi1>, vector<8x8xf32>
    %cst_27 = arith.constant 0.000000e+00 : f32
    %87 = vector.broadcast %cst_27 : f32 to vector<8x8xf32>
    %88 = arith.cmpf ogt, %3, %87 : vector<8x8xf32>
    %cst_28 = arith.constant -1.000000e+30 : f32
    %89 = vector.broadcast %cst_28 : f32 to vector<8x8xf32>
    %90 = arith.select %88, %86, %89 : vector<8x8xi1>, vector<8x8xf32>
    %cst_29 = arith.constant dense<0xFF800000> : vector<8xf32>
    %91 = vector.multi_reduction <maximumf>, %90, %cst_29 [1] : vector<8x8xf32> to vector<8xf32>
    %92 = vector.shape_cast %91 : vector<8xf32> to vector<8x1xf32>
    %93 = vector.broadcast %92 : vector<8x1xf32> to vector<8x8xf32>
    %94 = arith.subf %90, %93 : vector<8x8xf32>
    %95 = math.exp %94 : vector<8x8xf32>
    %cst_30 = arith.constant dense<0.000000e+00> : vector<8xf32>
    %96 = vector.multi_reduction <add>, %95, %cst_30 [1] : vector<8x8xf32> to vector<8xf32>
    %97 = vector.shape_cast %96 : vector<8xf32> to vector<8x1xf32>
    %98 = tpu.reciprocal %97 {approx = true} : vector<8x1xf32> -> vector<8x1xf32>
    %99 = vector.broadcast %98 : vector<8x1xf32> to vector<8x8xf32>
    %100 = arith.mulf %95, %99 : vector<8x8xf32>
    %101 = vector.extract_strided_slice %19 {offsets = [0, 16], sizes = [8, 8], strides = [1, 1]} : vector<8x32xf32> to vector<8x8xf32>
    %cst_31 = arith.constant dense<0.000000e+00> : vector<8x8xf32>
    %102 = tpu.matmul %100, %101, %cst_31 {dimension_numbers = #tpu.dot_dimension_numbers<[1], [0], [0], [1], [0, 0, 1, 1], [], []>} : vector<8x8xf32>, vector<8x8xf32>, vector<8x8xf32> -> vector<8x8xf32>
    %103 = vector.extract_strided_slice %20 {offsets = [0, 3], sizes = [8, 1], strides = [1, 1]} : vector<8x4xf32> to vector<8x1xf32>
    %104 = vector.extract_strided_slice %21 {offsets = [0, 3], sizes = [8, 1], strides = [1, 1]} : vector<8x4xf32> to vector<8x1xf32>
    %105 = tpu.transpose %104, [1, 0] : vector<8x1xf32> -> vector<1x8xf32>
    %106 = vector.broadcast %103 : vector<8x1xf32> to vector<8x8xf32>
    %107 = vector.broadcast %105 : vector<1x8xf32> to vector<8x8xf32>
    %108 = arith.addf %106, %107 : vector<8x8xf32>
    %cst_32 = arith.constant 0.000000e+00 : f32
    %109 = vector.broadcast %cst_32 : f32 to vector<8x8xf32>
    %110 = arith.cmpf oge, %108, %109 : vector<8x8xf32>
    %cst_33 = arith.constant 2.000000e-01 : f32
    %111 = vector.broadcast %cst_33 : f32 to vector<8x8xf32>
    %112 = arith.mulf %111, %108 : vector<8x8xf32>
    %113 = arith.select %110, %108, %112 : vector<8x8xi1>, vector<8x8xf32>
    %cst_34 = arith.constant 0.000000e+00 : f32
    %114 = vector.broadcast %cst_34 : f32 to vector<8x8xf32>
    %115 = arith.cmpf ogt, %3, %114 : vector<8x8xf32>
    %cst_35 = arith.constant -1.000000e+30 : f32
    %116 = vector.broadcast %cst_35 : f32 to vector<8x8xf32>
    %117 = arith.select %115, %113, %116 : vector<8x8xi1>, vector<8x8xf32>
    %cst_36 = arith.constant dense<0xFF800000> : vector<8xf32>
    %118 = vector.multi_reduction <maximumf>, %117, %cst_36 [1] : vector<8x8xf32> to vector<8xf32>
    %119 = vector.shape_cast %118 : vector<8xf32> to vector<8x1xf32>
    %120 = vector.broadcast %119 : vector<8x1xf32> to vector<8x8xf32>
    %121 = arith.subf %117, %120 : vector<8x8xf32>
    %122 = math.exp %121 : vector<8x8xf32>
    %cst_37 = arith.constant dense<0.000000e+00> : vector<8xf32>
    %123 = vector.multi_reduction <add>, %122, %cst_37 [1] : vector<8x8xf32> to vector<8xf32>
    %124 = vector.shape_cast %123 : vector<8xf32> to vector<8x1xf32>
    %125 = tpu.reciprocal %124 {approx = true} : vector<8x1xf32> -> vector<8x1xf32>
    %126 = vector.broadcast %125 : vector<8x1xf32> to vector<8x8xf32>
    %127 = arith.mulf %122, %126 : vector<8x8xf32>
    %128 = vector.extract_strided_slice %19 {offsets = [0, 24], sizes = [8, 8], strides = [1, 1]} : vector<8x32xf32> to vector<8x8xf32>
    %cst_38 = arith.constant dense<0.000000e+00> : vector<8x8xf32>
    %129 = tpu.matmul %127, %128, %cst_38 {dimension_numbers = #tpu.dot_dimension_numbers<[1], [0], [0], [1], [0, 0, 1, 1], [], []>} : vector<8x8xf32>, vector<8x8xf32>, vector<8x8xf32> -> vector<8x8xf32>
    %130 = tpu.concatenate %48, %75, %102, %129 in 1 : vector<8x8xf32>, vector<8x8xf32>, vector<8x8xf32>, vector<8x8xf32> -> vector<8x32xf32>
    %cst_39 = arith.constant 0.000000e+00 : f32
    %131 = vector.broadcast %cst_39 : f32 to vector<8x32xf32>
    %132 = arith.cmpf ogt, %130, %131 : vector<8x32xf32>
    %133 = math.exp %130 : vector<8x32xf32>
    %cst_40 = arith.constant 1.000000e+00 : f32
    %134 = vector.broadcast %cst_40 : f32 to vector<8x32xf32>
    %135 = arith.subf %133, %134 : vector<8x32xf32>
    %136 = arith.select %132, %130, %135 : vector<8x32xi1>, vector<8x32xf32>
    %137 = vector.extract_strided_slice %5 {offsets = [0, 0], sizes = [8, 1], strides = [1, 1]} : vector<8x3xf32> to vector<8x1xf32>
    %138 = vector.broadcast %137 : vector<8x1xf32> to vector<8x32xf32>
    %139 = arith.mulf %138, %136 : vector<8x32xf32>
    %140 = vector.extract_strided_slice %5 {offsets = [0, 1], sizes = [8, 1], strides = [1, 1]} : vector<8x3xf32> to vector<8x1xf32>
    %141 = vector.broadcast %140 : vector<8x1xf32> to vector<8x32xf32>
    %142 = arith.mulf %141, %136 : vector<8x32xf32>
    %143 = vector.extract_strided_slice %5 {offsets = [0, 2], sizes = [8, 1], strides = [1, 1]} : vector<8x3xf32> to vector<8x1xf32>
    %144 = vector.broadcast %143 : vector<8x1xf32> to vector<8x32xf32>
    %145 = arith.mulf %144, %136 : vector<8x32xf32>
    %146 = tpu.concatenate %139, %142, %145, %6 in 1 : vector<8x32xf32>, vector<8x32xf32>, vector<8x32xf32>, vector<8x1xf32> -> vector<8x97xf32>
    %c0_41 = arith.constant 0 : index
    %c0_42 = arith.constant 0 : index
    %147 = vector.load %arg5[%c0_41, %c0_42] : memref<97x10xf32, #tpu.memory_space<vmem>>, vector<97x10xf32>
    %cst_43 = arith.constant dense<0.000000e+00> : vector<8x10xf32>
    %148 = tpu.matmul %146, %147, %cst_43 {dimension_numbers = #tpu.dot_dimension_numbers<[1], [0], [0], [1], [0, 0, 1, 1], [], []>} : vector<8x97xf32>, vector<97x10xf32>, vector<8x10xf32> -> vector<8x10xf32>
    %149 = vector.extract_strided_slice %148 {offsets = [0, 0], sizes = [8, 8], strides = [1, 1]} : vector<8x10xf32> to vector<8x8xf32>
    %150 = vector.extract_strided_slice %148 {offsets = [0, 8], sizes = [8, 1], strides = [1, 1]} : vector<8x10xf32> to vector<8x1xf32>
    %151 = vector.extract_strided_slice %148 {offsets = [0, 9], sizes = [8, 1], strides = [1, 1]} : vector<8x10xf32> to vector<8x1xf32>
    %152 = tpu.transpose %151, [1, 0] : vector<8x1xf32> -> vector<1x8xf32>
    %153 = vector.broadcast %150 : vector<8x1xf32> to vector<8x8xf32>
    %154 = vector.broadcast %152 : vector<1x8xf32> to vector<8x8xf32>
    %155 = arith.addf %153, %154 : vector<8x8xf32>
    %cst_44 = arith.constant 0.000000e+00 : f32
    %156 = vector.broadcast %cst_44 : f32 to vector<8x8xf32>
    %157 = arith.cmpf oge, %155, %156 : vector<8x8xf32>
    %cst_45 = arith.constant 2.000000e-01 : f32
    %158 = vector.broadcast %cst_45 : f32 to vector<8x8xf32>
    %159 = arith.mulf %158, %155 : vector<8x8xf32>
    %160 = arith.select %157, %155, %159 : vector<8x8xi1>, vector<8x8xf32>
    %cst_46 = arith.constant 0.000000e+00 : f32
    %161 = vector.broadcast %cst_46 : f32 to vector<8x8xf32>
    %162 = arith.cmpf ogt, %3, %161 : vector<8x8xf32>
    %cst_47 = arith.constant -1.000000e+30 : f32
    %163 = vector.broadcast %cst_47 : f32 to vector<8x8xf32>
    %164 = arith.select %162, %160, %163 : vector<8x8xi1>, vector<8x8xf32>
    %cst_48 = arith.constant dense<0xFF800000> : vector<8xf32>
    %165 = vector.multi_reduction <maximumf>, %164, %cst_48 [1] : vector<8x8xf32> to vector<8xf32>
    %166 = vector.shape_cast %165 : vector<8xf32> to vector<8x1xf32>
    %167 = vector.broadcast %166 : vector<8x1xf32> to vector<8x8xf32>
    %168 = arith.subf %164, %167 : vector<8x8xf32>
    %169 = math.exp %168 : vector<8x8xf32>
    %cst_49 = arith.constant dense<0.000000e+00> : vector<8xf32>
    %170 = vector.multi_reduction <add>, %169, %cst_49 [1] : vector<8x8xf32> to vector<8xf32>
    %171 = vector.shape_cast %170 : vector<8xf32> to vector<8x1xf32>
    %172 = tpu.reciprocal %171 {approx = true} : vector<8x1xf32> -> vector<8x1xf32>
    %173 = vector.broadcast %172 : vector<8x1xf32> to vector<8x8xf32>
    %174 = arith.mulf %169, %173 : vector<8x8xf32>
    %cst_50 = arith.constant dense<0.000000e+00> : vector<8x8xf32>
    %175 = tpu.matmul %174, %149, %cst_50 {dimension_numbers = #tpu.dot_dimension_numbers<[1], [0], [0], [1], [0, 0, 1, 1], [], []>} : vector<8x8xf32>, vector<8x8xf32>, vector<8x8xf32> -> vector<8x8xf32>
    %cst_51 = arith.constant 0.000000e+00 : f32
    %176 = vector.broadcast %cst_51 : f32 to vector<8x8xf32>
    %177 = arith.cmpf ogt, %175, %176 : vector<8x8xf32>
    %178 = math.exp %175 : vector<8x8xf32>
    %cst_52 = arith.constant 1.000000e+00 : f32
    %179 = vector.broadcast %cst_52 : f32 to vector<8x8xf32>
    %180 = arith.subf %178, %179 : vector<8x8xf32>
    %181 = arith.select %177, %175, %180 : vector<8x8xi1>, vector<8x8xf32>
    %182 = tpu.iota {dimensions = array<i32: 1>} : vector<1x8xi32>
    %183 = tpu.iota {dimensions = array<i32: 0>} : vector<1x8xi32>
    %c8_i32 = arith.constant 8 : i32
    %184 = vector.broadcast %c8_i32 : i32 to vector<1x8xi32>
    %185 = arith.muli %183, %184 : vector<1x8xi32>
    %186 = arith.cmpi eq, %182, %185 : vector<1x8xi32>
    %187 = arith.extui %186 : vector<1x8xi1> to vector<1x8xi32>
    %188 = arith.sitofp %187 : vector<1x8xi32> to vector<1x8xf32>
    %c8_i32_53 = arith.constant 8 : i32
    %189 = vector.broadcast %c8_i32_53 : i32 to vector<1x8xi32>
    %190 = arith.muli %183, %189 : vector<1x8xi32>
    %c1_i32 = arith.constant 1 : i32
    %191 = vector.broadcast %c1_i32 : i32 to vector<1x8xi32>
    %192 = arith.addi %190, %191 : vector<1x8xi32>
    %193 = arith.cmpi eq, %182, %192 : vector<1x8xi32>
    %194 = arith.extui %193 : vector<1x8xi1> to vector<1x8xi32>
    %195 = arith.sitofp %194 : vector<1x8xi32> to vector<1x8xf32>
    %cst_54 = arith.constant dense<0.000000e+00> : vector<1x8xf32>
    %196 = tpu.matmul %188, %181, %cst_54 {dimension_numbers = #tpu.dot_dimension_numbers<[1], [0], [0], [1], [0, 0, 1, 1], [], []>} : vector<1x8xf32>, vector<8x8xf32>, vector<1x8xf32> -> vector<1x8xf32>
    %cst_55 = arith.constant dense<0.000000e+00> : vector<1x8xf32>
    %197 = tpu.matmul %195, %181, %cst_55 {dimension_numbers = #tpu.dot_dimension_numbers<[1], [0], [0], [1], [0, 0, 1, 1], [], []>} : vector<1x8xf32>, vector<8x8xf32>, vector<1x8xf32> -> vector<1x8xf32>
    %c0_56 = arith.constant 0 : index
    %c0_57 = arith.constant 0 : index
    %198 = vector.load %arg9[%c0_56, %c0_57] : memref<1x34xf32, #tpu.memory_space<vmem>>, vector<1x34xf32>
    %199 = vector.extract_strided_slice %198 {offsets = [0, 0], sizes = [1, 24], strides = [1, 1]} : vector<1x34xf32> to vector<1x24xf32>
    %200 = vector.extract_strided_slice %198 {offsets = [0, 24], sizes = [1, 8], strides = [1, 1]} : vector<1x34xf32> to vector<1x8xf32>
    %201 = vector.extract_strided_slice %198 {offsets = [0, 32], sizes = [1, 2], strides = [1, 1]} : vector<1x34xf32> to vector<1x2xf32>
    %202 = arith.mulf %196, %197 : vector<1x8xf32>
    %c0_58 = arith.constant 0 : index
    %c0_59 = arith.constant 0 : index
    %203 = vector.load %arg6[%c0_58, %c0_59] : memref<8x24xf32, #tpu.memory_space<vmem>>, vector<8x24xf32>
    %cst_60 = arith.constant dense<0.000000e+00> : vector<1x24xf32>
    %204 = tpu.matmul %202, %203, %cst_60 {dimension_numbers = #tpu.dot_dimension_numbers<[1], [0], [0], [1], [0, 0, 1, 1], [], []>} : vector<1x8xf32>, vector<8x24xf32>, vector<1x24xf32> -> vector<1x24xf32>
    %205 = arith.addf %204, %199 : vector<1x24xf32>
    %cst_61 = arith.constant 0.000000e+00 : f32
    %206 = vector.broadcast %cst_61 : f32 to vector<1x24xf32>
    %207 = arith.maximumf %205, %206 : vector<1x24xf32>
    %c0_62 = arith.constant 0 : index
    %c0_63 = arith.constant 0 : index
    %208 = vector.load %arg7[%c0_62, %c0_63] : memref<24x8xf32, #tpu.memory_space<vmem>>, vector<24x8xf32>
    %cst_64 = arith.constant dense<0.000000e+00> : vector<1x8xf32>
    %209 = tpu.matmul %207, %208, %cst_64 {dimension_numbers = #tpu.dot_dimension_numbers<[1], [0], [0], [1], [0, 0, 1, 1], [], []>} : vector<1x24xf32>, vector<24x8xf32>, vector<1x8xf32> -> vector<1x8xf32>
    %210 = arith.addf %209, %200 : vector<1x8xf32>
    %cst_65 = arith.constant 0.000000e+00 : f32
    %211 = vector.broadcast %cst_65 : f32 to vector<1x8xf32>
    %212 = arith.maximumf %210, %211 : vector<1x8xf32>
    %c0_66 = arith.constant 0 : index
    %c0_67 = arith.constant 0 : index
    %213 = vector.load %arg8[%c0_66, %c0_67] : memref<8x2xf32, #tpu.memory_space<vmem>>, vector<8x2xf32>
    %cst_68 = arith.constant dense<0.000000e+00> : vector<1x2xf32>
    %214 = tpu.matmul %212, %213, %cst_68 {dimension_numbers = #tpu.dot_dimension_numbers<[1], [0], [0], [1], [0, 0, 1, 1], [], []>} : vector<1x8xf32>, vector<8x2xf32>, vector<1x2xf32> -> vector<1x2xf32>
    %215 = arith.addf %214, %201 : vector<1x2xf32>
    %cst_69 = arith.constant dense<0xFF800000> : vector<1xf32>
    %216 = vector.multi_reduction <maximumf>, %215, %cst_69 [1] : vector<1x2xf32> to vector<1xf32>
    %217 = vector.shape_cast %216 : vector<1xf32> to vector<1x1xf32>
    %218 = vector.broadcast %217 : vector<1x1xf32> to vector<1x2xf32>
    %219 = arith.subf %215, %218 : vector<1x2xf32>
    %220 = math.exp %219 : vector<1x2xf32>
    %cst_70 = arith.constant dense<0.000000e+00> : vector<1xf32>
    %221 = vector.multi_reduction <add>, %220, %cst_70 [1] : vector<1x2xf32> to vector<1xf32>
    %222 = vector.shape_cast %221 : vector<1xf32> to vector<1x1xf32>
    %223 = math.log %222 : vector<1x1xf32>
    %224 = arith.addf %217, %223 : vector<1x1xf32>
    %225 = vector.broadcast %224 : vector<1x1xf32> to vector<1x2xf32>
    %226 = arith.subf %215, %225 : vector<1x2xf32>
    %227 = vector.shape_cast %226 : vector<1x2xf32> to vector<1x1x2xf32>
    %c0_71 = arith.constant 0 : index
    %c0_72 = arith.constant 0 : index
    %c0_73 = arith.constant 0 : index
    %228 = vector.load %arg10[%c0_71, %c0_72, %c0_73] : memref<1x1x2xf32, #tpu.memory_space<vmem>>, vector<1x1x2xf32>
    tpu.vector_store %arg10[%c0_71, %c0_72, %c0_73], %227 {strides = array<i32>} : memref<1x1x2xf32, #tpu.memory_space<vmem>>, vector<1x1x2xf32>,
    return
  }
  func.func @transform_0(%arg0: i32) -> (i32, i32, i32) {
    %c0_i32 = arith.constant 0 : i32
    %c0_i32_0 = arith.constant 0 : i32
    %c0_i32_1 = arith.constant 0 : i32
    return %arg0, %c0_i32, %c0_i32_0 : i32, i32, i32
  }
  func.func @transform_1(%arg0: i32) -> (i32, i32, i32) {
    %c0_i32 = arith.constant 0 : i32
    %c0_i32_0 = arith.constant 0 : i32
    %c0_i32_1 = arith.constant 0 : i32
    return %arg0, %c0_i32, %c0_i32_0 : i32, i32, i32
  }
  func.func @transform_2(%arg0: i32) -> (i32, i32, i32) {
    %c0_i32 = arith.constant 0 : i32
    %c0_i32_0 = arith.constant 0 : i32
    %c0_i32_1 = arith.constant 0 : i32
    return %arg0, %c0_i32, %c0_i32_0 : i32, i32, i32
  }
  func.func @transform_3(%arg0: i32) -> (i32, i32) {
    %c0_i32 = arith.constant 0 : i32
    %c0_i32_0 = arith.constant 0 : i32
    %c0_i32_1 = arith.constant 0 : i32
    return %c0_i32, %c0_i32_0 : i32, i32
  }
  func.func @transform_4(%arg0: i32) -> (i32, i32) {
    %c0_i32 = arith.constant 0 : i32
    %c0_i32_0 = arith.constant 0 : i32
    %c0_i32_1 = arith.constant 0 : i32
    return %c0_i32, %c0_i32_0 : i32, i32
  }
  func.func @transform_5(%arg0: i32) -> (i32, i32) {
    %c0_i32 = arith.constant 0 : i32
    %c0_i32_0 = arith.constant 0 : i32
    %c0_i32_1 = arith.constant 0 : i32
    return %c0_i32, %c0_i32_0 : i32, i32
  }
  func.func @transform_6(%arg0: i32) -> (i32, i32) {
    %c0_i32 = arith.constant 0 : i32
    %c0_i32_0 = arith.constant 0 : i32
    %c0_i32_1 = arith.constant 0 : i32
    return %c0_i32, %c0_i32_0 : i32, i32
  }
  func.func @transform_7(%arg0: i32) -> (i32, i32) {
    %c0_i32 = arith.constant 0 : i32
    %c0_i32_0 = arith.constant 0 : i32
    %c0_i32_1 = arith.constant 0 : i32
    return %c0_i32, %c0_i32_0 : i32, i32
  }
  func.func @transform_8(%arg0: i32) -> (i32, i32) {
    %c0_i32 = arith.constant 0 : i32
    %c0_i32_0 = arith.constant 0 : i32
    %c0_i32_1 = arith.constant 0 : i32
    return %c0_i32, %c0_i32_0 : i32, i32
  }
  func.func @transform_9(%arg0: i32) -> (i32, i32, i32) {
    %c0_i32 = arith.constant 0 : i32
    %c0_i32_0 = arith.constant 0 : i32
    %c0_i32_1 = arith.constant 0 : i32
    return %arg0, %c0_i32, %c0_i32_0 : i32, i32, i32
  }
}

</mosaic_0001>

<bundles_post_ra>
// kernel: tpu_custom_call.1
= control target key start
LH: loop header
LB: loop body
LE: loop exit
PB: predicated region body
PF: predicated region fallthrough
CT: control target
= control target key end

     0   :  { %14 = vsyncpa [#allocation3], 0  ;;  %s2614_s0 = inlined_call_operand.vmem [shape: f32[2,8,32], index: 0, kind: input, shape index: {}]   ;;  %s2615_s1 = inlined_call_operand.vmem [shape: f32[2,8,8], index: 1, kind: input, shape index: {}]   ;;  %s2616_s2 = inlined_call_operand.vmem [shape: f32[2,8,3], index: 2, kind: input, shape index: {}]   ;;  %s2617_s3 = inlined_call_operand.vmem [shape: f32[97,40], index: 3, kind: input, shape index: {}]   ;;  %s2618_s4 = inlined_call_operand.vmem [shape: f32[97,10], index: 4, kind: input, shape index: {}]   ;;  %s2619_s5 = inlined_call_operand.vmem [shape: f32[8,24], index: 5, kind: input, shape index: {}]   ;;  %s2620_s6 = inlined_call_operand.vmem [shape: f32[24,8], index: 6, kind: input, shape index: {}]   ;;  %s2621_s7 = inlined_call_operand.vmem [shape: f32[8,2], index: 7, kind: input, shape index: {}]   ;;  %s2622_s8 = inlined_call_operand.vmem [shape: f32[1,34], index: 8, kind: input, shape index: {}]   ;;  %s2623_s9 = inlined_call_operand.hbm [shape: f32[2,1,2], index: 9, kind: output, shape index: {}]  }
   0x1   :  { %16 = vsyncpa [#allocation3 + $0x1], 0  ;;  %s2262_s30 = smov 0   ;;  %s2264_s10 = smov 0  }
   0x2   :  { %s2266_s11 = smov 0   ;;  %s2268_s12 = smov 0  }
   0x3 LB: > { %s2283_s13 = sadd.s32 4294967295, %s2184_s12   ;;  %s1792_s14 = sadd.s32 4294967294, %s2184_s12   ;;  %s2184_s12 = sphi %s2268_s12, %s2629_s12   ;;  %s2180_s11 = sphi %s2266_s11, %s2628_s11   ;;  %s2176_s10 = sphi %s2264_s10, %s2627_s10   ;;  %s2172_s30 = sphi %s2262_s30, %s2626_s30  }
   0x4   : > { %s2287_s15 = sadd.s32 1, %s2184_s12   ;;  %s233_s16 = sadd.s32 1, %s2180_s11 }
   0x5   : > { %s230_s17 = ssub.s32 %s2184_s12, %s2287_s15  ;;  %p243_p0 = scmp.ne.s32.totalorder %s2180_s11, %s2176_s10 }
   0x6   : > { %p231_p1 = scmp.eq.s32.totalorder %s230_s17, 0  ;;  %p244_p2 = scmp.eq.s32.totalorder %s2283_s13, 1 }
   0x7   : > { %p249_p3 = scmp.ne.s32.totalorder %s2176_s10, %s2172_s30  ;;  %p250_p4 = scmp.eq.s32.totalorder %s1792_s14, 1 }
   0x8   : > { %s2298_s18 = scalar_select %p231_p1, %s2180_s11, %s233_s16  }
   0x9   : > { %p2300_p5 = por %p244_p2, %p243_p0  ;;  %p2304_p6 = por %p250_p4, %p249_p3 }
   0xa   : > { %p1795_p7 = scmp.ge.s32.totalorder %s2184_s12, 1  ;;  %p307_p8 = scmp.lt.s32.totalorder %s2184_s12, 3 }
   0xc   : > { %p308_p9 = pnand %p1795_p7, %p307_p8 }
   0xd   : > { %p349_p10 = scmp.lt.s32.totalorder (!%p308_p9), %s2283_s13, 1  ;;  %v2186_v0 = vmov (!%p308_p9), 1   ;;  %v2187_v1 = vmov (!%p308_p9), 0   ;;  %v2188_v3 = vmov (!%p308_p9), 2   ;;  %v394_v4 = vld [vmem:[%s2617_s3] sm:$0xff] (!%p308_p9)  ;;  %v395_v5 = vld [vmem:[%s2617_s3 + $0x8] sm:$0xff] (!%p308_p9)  ;;  %v525_v47 = vlaneseq (!%p308_p9) }
   0xe   : > { %311 = sbr.rel (%p308_p9) target bundleno = 3735 (0xe97), region = 56  ;;  %2085 = vset.pattern.permute.xlu0 (!%p308_p9), %v2186_v0  ;;  %2087 = vset.pattern.permute.xlu1 (!%p308_p9), %v2187_v1  ;;  %v396_v6 = vld [vmem:[%s2617_s3 + $0x10] sm:$0xff] (!%p308_p9)  ;;  %v2189_v7 = vmov (!%p308_p9), 0.0|0.0   ;;  %v1983_v8 = vpack.c.bf16 (!%p308_p9), %v395_v5, %v394_v4  ;;  %v397_v9 = vld [vmem:[%s2617_s3 + $0x18] sm:$0xff] (!%p308_p9)  ;;  %v398_v11 = vld [vmem:[%s2617_s3 + $0x20] sm:$0xff] (!%p308_p9)  ;;  %v2190_v23 = vmov (!%p308_p9), 0.0  }
   0xf   : > { %1982 = vmatprep.subr.bf16.mxu0 (!%p308_p9), %v2189_v7  ;;  %v1986_v10 = vpack.c.bf16 (!%p308_p9), %v397_v9, %v396_v6  ;;  %v399_v12 = vld [vmem:[%s2617_s3 + $0x28] sm:$0xff] (!%p308_p9)  ;;  %v400_v14 = vld [vmem:[%s2617_s3 + $0x30] sm:$0xff] (!%p308_p9)  ;;  %v401_v15 = vld [vmem:[%s2617_s3 + $0x38] sm:$0xff] (!%p308_p9)  ;;  %vm411_vm0 = vcmask (!%p308_p9), 1040384   ;;  %1899 = vmatprep.subr.mxu1 (!%p308_p9), %v2190_v23  ;;  %vm2191_vm1 = vmmov (!%p308_p9), 0   ;;  %s2193_s23 = smov (!%p308_p9), 64  }
  0x10   : > { %1984 = vmatpush3.bf16.msra.mxu0 (!%p308_p9), %v1983_v8  ;;  %v1989_v13 = vpack.c.bf16 (!%p308_p9), %v399_v12, %v398_v11  ;;  %v1992_v16 = vpack.c.bf16 (!%p308_p9), %v401_v15, %v400_v14  ;;  %v402_v17 = vld [vmem:[%s2617_s3 + $0x40] sm:$0xff] (!%p308_p9)  ;;  %v403_v18 = vld [vmem:[%s2617_s3 + $0x48] sm:$0xff] (!%p308_p9)  ;;  %v404_v20 = vld [vmem:[%s2617_s3 + $0x50] sm:$0xff] (!%p308_p9)  ;;  %1896 = vmatprep.mubr.msk.f32.mxu0 (!%p308_p9), %vm2191_vm1, %v2190_v23  ;;  %vm388_vm2 = vcmask (!%p308_p9), 261120   ;;  %vm390_vm3 = vcmask (!%p308_p9), 523264   ;;  %s2196_s24 = smov (!%p308_p9), 91  }
  0x11   : > { %1985 = vmatprep.subr.bf16.mxu0 (!%p308_p9), %v2189_v7  ;;  %v1995_v19 = vpack.c.bf16 (!%p308_p9), %v403_v18, %v402_v17  ;;  %v405_v21 = vld [vmem:[%s2617_s3 + $0x58] sm:$0xff] (!%p308_p9)  ;;  %v406_v24 = vld [vmem:[%s2617_s3 + $0x60] sm:$0x1] (!%p308_p9)  ;;  %1901 = vmatprep.mubr.msk.f32.mxu1 (!%p308_p9), %vm2191_vm1, %v2190_v23  ;;  %vm392_vm4 = vcmask (!%p308_p9), 785408   ;;  %vm407_vm5 = vcmask (!%p308_p9), 793600   ;;  %v2194_v37 = vmov (!%p308_p9), 33  }
  0x12   : > { %v1998_v22 = vpack.c.bf16 (!%p308_p9), %v405_v21, %v404_v20  ;;  %v2195_v38 = vmov (!%p308_p9), 32   ;;  %s2198_s26 = smov (!%p308_p9), 89   ;;  %s2199_s27 = smov (!%p308_p9), 90   ;;  %v2200_v41 = vmov (!%p308_p9), 34   ;;  %v2201_v42 = vmov (!%p308_p9), 35  }
  0x13   : > { %v2405_v50 = vshrl.u32 (!%p308_p9), %v525_v47, 7  ;;  %vm535_vm8 = vcmask (!%p308_p9), 64512   ;;  %s2203_s16 = smov (!%p308_p9), 104   ;;  %s2204_s17 = smov (!%p308_p9), 112   ;;  %vm1038_vm12 = vcmask (!%p308_p9), 130048   ;;  %vm1040_vm13 = vcmask (!%p308_p9), 195584  }
  0x14   : > { %1987 = vmatpush3.bf16.msra.mxu0 (!%p308_p9), %v1986_v10 }
  0x15   : > { %s350_s21 = scalar_select %p349_p10, %s2283_s13, 1  ;;  %1988 = vmatprep.subr.bf16.mxu0 %v2189_v7  ;;  %v2408_v53 = vsub.s32 0, %v2405_v50 }
  0x17   : > { %s2312_s22 = sshll.u32 %s350_s21, 3  ;;  %s2192_s21 = smov 32  }
  0x18   : > { %s360_s25 = scalar_lea.vmem %s2616_s2, %s2312_s22  ;;  %1990 = vmatpush3.bf16.msra.mxu0 %v1989_v13  ;;  %s352_s14 = scalar_lea.vmem %s2614_s0, %s2312_s22 }
  0x19   : > { %v363_v2 = vld [vmem:[%s360_s25] sm:$0xff]  ;;  %1991 = vmatprep.subr.bf16.mxu0 %v2189_v7  ;;  %s2197_s25 = smov 92  }
  0x1a   : > { %371 = vperm.xlu0 %2085, %v363_v2   ;;  %366 = vperm.xlu1 %2087, %v363_v2   ;;  %v361_v25 = vld [vmem:[%s352_s14] sm:$0xff]  ;;  %s356_s14 = scalar_lea.vmem %s2615_s1, %s2312_s22  ;;  %s2202_s22 = smov 120  }
  0x1b   : > { %v2414_v56 = vld [vmem:[%s356_s14] sm:$0xff] }
  0x1c   : > { %1993 = vmatpush3.bf16.msra.mxu0 %v1992_v16  ;;  %vm533_vm6 = vcmp.gt.f32.partialorder %v2414_v56, 0.0 }
  0x1d   : > { %1994 = vmatprep.subr.bf16.mxu0 %v2189_v7 }
  0x1e   : > { %2086 = vset.pattern.permute.xlu0 %v2188_v3  ;;  %2089 = vset.pattern.permute.xlu1 %v2194_v37 }
  0x1f   : > { %376 = vperm.xlu0 %2086, %v363_v2  }
  0x20   : > { %1996 = vmatpush3.bf16.msra.mxu0 %v1995_v19 }
  0x21   : > { %1997 = vmatprep.subr.bf16.mxu0 %v2189_v7 }
  0x23   : > { %2088 = vset.pattern.permute.xlu0 %v2195_v38 }
  0x24   : > { %1999 = vmatpush3.bf16.msra.mxu0 %v1998_v22 }
  0x25   : > { %1894 = vmatprep.subr.mxu0 %v2190_v23 }
  0x28   : > { %1895 = vmatpush3.msk.msra.mxu0 %vm411_vm0, %v406_v24 }
  0x29   : > { %1948 = vmatprep.subr.mxu0 %v2190_v23 }
  0x99   : > { %v2375_v26 = vpop.permute.xlu0 %371  ;;  %v2383_v30 = vpop.permute.xlu1 %366 }
  0x9a   : > { %v374_v27 = vmul.f32 %v2375_v26, %v361_v25  ;;  %v369_v32 = vmul.f32 %v2383_v30, %v361_v25 }
  0x9c   : > { %381 = vrot.lane.b32.xlu1 %v374_v27, %s2192_s21 }
  0x9e   : > { %v2379_v28 = vpop.permute.xlu0 %376 }
  0x9f   : > { %v379_v29 = vmul.f32 %v2379_v28, %v361_v25 }
  0xa1   : > { %385 = vrot.lane.b32.xlu1 %v379_v29, %s2193_s23 }
 0x10e   : > { %v382_v31 = vpop.permute.xlu1 %381 }
 0x10f   : > { %v389_v33 = vsel %vm388_vm2, %v369_v32, %v382_v31 }
 0x113   : > { %v386_v34 = vpop.permute.xlu1 %385 }
 0x114   : > { %v391_v35 = vsel %vm390_vm3, %v389_v33, %v386_v34 }
 0x115   : > { %v393_v36 = vsel %vm392_vm4, %v391_v35, 1.0 }
 0x116   : > { %1897 = vmatmul.mubr.msk.f32.vlgmr.msra.gmra.mrb[0].mxu0 %vm407_vm5, %v393_v36 }
 0x117   : > { %1950 = vmatprep.mubr.msk.f32.mxu0 %vm2191_vm1, %v2190_v23 }
 0x1e9   : > { %v2392_v39 = vpop.f32.mrb[0].mxu0 }
 0x1ea   : > { %620 = vrot.lane.b32.xlu1 %v2392_v39, %s2196_s24  ;;  %486 = vrot.lane.b32.xlu0 %v2392_v39, %s2197_s25  ;;  %v1898_v40 = vpop.f32.mrb[1].mxu0  ;;  %s2205_s24 = smov 8   ;;  %s2206_s25 = smov 16  }
 0x1eb   : > { %1900 = vmatpush3.msra.mxu1 %v2392_v39 }
 0x1ec   : > { %1904 = vmatprep.subr.mxu1 %v2190_v23 }
 0x1ee   : > { %890 = vrot.lane.b32.xlu1 %v2392_v39, %s2198_s26  ;;  %755 = vrot.lane.b32.xlu0 %v2392_v39, %s2199_s27  ;;  %s2207_s26 = smov 24   ;;  %s1817_s27 = sshll.u32 %s2283_s13, 4 }
 0x1ef   : > { %s2211_s13 = smov [#allocation2]  }
 0x1f2   : > { %656 = vperm.xlu1 %2089, %v2392_v39   ;;  %522 = vperm.xlu0 %2088, %v2392_v39  }
 0x1f6   : > { %2090 = vset.pattern.permute.xlu1 %v2200_v41  ;;  %2091 = vset.pattern.permute.xlu0 %v2201_v42 }
 0x1f7   : > { %791 = vperm.xlu1 %2090, %v2392_v39   ;;  %926 = vperm.xlu0 %2091, %v2392_v39  }
 0x25c   : > { %v621_v43 = vpop.permute.xlu1 %620  ;;  %v487_v44 = vpop.permute.xlu0 %486 }
 0x25d   : > { %623 = vxpose.xlu0.b32.start.end [1/1] (short) (narrow) %v621_v43, 8  ;;  %489 = vxpose.xlu1.b32.start.end [1/1] (short) (narrow) %v487_v44, 8 }
 0x260   : > { %v891_v45 = vpop.permute.xlu1 %890  ;;  %v756_v46 = vpop.permute.xlu0 %755 }
 0x261   : > { %893 = vxpose.xlu1.b32.start.end [1/1] (short) (narrow) %v891_v45, 8  ;;  %758 = vxpose.xlu0.b32.start.end [1/1] (short) (narrow) %v756_v46, 8 }
 0x271   : > { %v657_v48 = vpop.permute.xlu1 %656  ;;  %v523_v49 = vpop.permute.xlu0 %522 }
 0x276   : > { %v792_v51 = vpop.permute.xlu1 %791  ;;  %v927_v52 = vpop.permute.xlu0 %926 }
 0x2dd   : > { %v505_v54 = vpop.trf.xlu1  ;;  %v639_v55 = vpop.trf.xlu0 }
 0x2de   : > { %v528_v57 = vrot.slane %v505_v54, %v2408_v53  ;;  %v662_v58 = vrot.slane %v639_v55, %v2408_v53 }
 0x2e0   : > { %v529_v59 = vadd.f32 %v528_v57, %v523_v49  ;;  %v663_v60 = vadd.f32 %v662_v58, %v657_v48 }
 0x2e1   : > { %v909_v61 = vpop.trf.xlu1  ;;  %v774_v62 = vpop.trf.xlu0 }
 0x2e2   : > { %v932_v63 = vrot.slane %v909_v61, %v2408_v53  ;;  %v797_v0 = vrot.slane %v774_v62, %v2408_v53  ;;  %vm530_vm7 = vcmp.ge.f32.partialorder %v529_v59, 0.0  ;;  %v531_v1 = vmul.f32 0.2, %v529_v59 }
 0x2e3   : > { %vm664_vm9 = vcmp.ge.f32.partialorder %v663_v60, 0.0  ;;  %v665_v2 = vmul.f32 0.2, %v663_v60 }
 0x2e4   : > { %v933_v3 = vadd.f32 %v932_v63, %v927_v52  ;;  %v798_v4 = vadd.f32 %v797_v0, %v792_v51  ;;  %v532_v5 = vsel %vm530_vm7, %v529_v59, %v531_v1 }
 0x2e5   : > { %v534_v6 = vsel %vm533_vm6, %v532_v5, -1e+30  ;;  %v666_v8 = vsel %vm664_vm9, %v663_v60, %v665_v2 }
 0x2e6   : > { %v536_v9 = vsel %vm535_vm8, %v534_v6, -inf  ;;  %v667_v10 = vsel %vm533_vm6, %v666_v8, -1e+30  ;;  %vm934_vm10 = vcmp.ge.f32.partialorder %v933_v3, 0.0  ;;  %v935_v11 = vmul.f32 0.2, %v933_v3 }
 0x2e7   : > { %537 = vmax.xlane.f32.xlu0 %v536_v9  ;;  %v668_v12 = vsel %vm535_vm8, %v667_v10, -inf  ;;  %vm799_vm11 = vcmp.ge.f32.partialorder %v798_v4, 0.0  ;;  %v800_v13 = vmul.f32 0.2, %v798_v4  ;;  %v1061_v8 = vld [vmem:[%s2618_s4] sm:$0xff]  ;;  %v1062_v9 = vld [vmem:[%s2618_s4 + $0x8] sm:$0xff] }
 0x2e8   : > { %669 = vmax.xlane.f32.xlu1 %v668_v12  ;;  %v936_v14 = vsel %vm934_vm10, %v933_v3, %v935_v11  ;;  %v2001_v11 = vpack.c.bf16 %v1062_v9, %v1061_v8  ;;  %v1064_v12 = vld [vmem:[%s2618_s4 + $0x18] sm:$0xff]  ;;  %v1289_v8 = vand.u32 127, %v525_v47  ;;  %v1292_v9 = vmul.u32 8, %v2405_v50  ;;  %v1448_v50 = vld [vmem:[%s2619_s5] sm:$0xff] }
 0x2e9   : > { %v937_v15 = vsel %vm533_vm6, %v936_v14, -1e+30  ;;  %v801_v16 = vsel %vm799_vm11, %v798_v4, %v800_v13  ;;  %v1065_v14 = vld [vmem:[%s2618_s4 + $0x20] sm:$0xff] }
 0x2ea   : > { %v938_v17 = vsel %vm535_vm8, %v937_v15, -inf  ;;  %v802_v18 = vsel %vm533_vm6, %v801_v16, -1e+30 }
 0x2eb   : > { %939 = vmax.xlane.f32.xlu0 %v938_v17  ;;  %v803_v19 = vsel %vm535_vm8, %v802_v18, -inf  ;;  %v1067_v17 = vld [vmem:[%s2618_s4 + $0x30] sm:$0xff] }
 0x2ec   : > { %804 = vmax.xlane.f32.xlu1 %v803_v19 }
 0x2fd   : > { %679 = vrot.lane.b32.xlu1 %v2392_v39, %s2202_s22 }
 0x374   : > { %v538_v20 = vpop.xlane.xlu0 %537 }
 0x375   : > { %v670_v21 = vpop.xlane.xlu1 %669  ;;  %v539_v22 = vsub.f32 %v534_v6, %v538_v20  ;;  %v1069_v20 = vld [vmem:[%s2618_s4 + $0x40] sm:$0xff] }
 0x376   : > { %v671_v24 = vsub.f32 %v667_v10, %v670_v21  ;;  %v1063_v10 = vld [vmem:[%s2618_s4 + $0x10] sm:$0xff]  ;;  %v1070_v21 = vld [vmem:[%s2618_s4 + $0x48] sm:$0xff] }
 0x377   : > { %v540_v25 = vmul.f32 1.442695, %v539_v22  ;;  %v2004_v13 = vpack.c.bf16 %v1064_v12, %v1063_v10  ;;  %v2013_v22 = vpack.c.bf16 %v1070_v21, %v1069_v20  ;;  %v1296_v10 = vadd.s32 1, %v1292_v9  ;;  %v1523_v20 = vld [vmem:[%s2620_s6] sm:$0xff]  ;;  %v1524_v21 = vld [vmem:[%s2620_s6 + $0x8] sm:$0xff] }
 0x378   : > { %v672_v27 = vmul.f32 1.442695, %v671_v24  ;;  %v940_v29 = vpop.xlane.xlu0 %939  ;;  %v1071_v24 = vld [vmem:[%s2618_s4 + $0x50] sm:$0xff] }
 0x379   : > { %2094 = vpow2.f32 %v540_v25  ;;  %v805_v31 = vpop.xlane.xlu1 %804  ;;  %v941_v32 = vsub.f32 %v937_v15, %v940_v29  ;;  %v1066_v15 = vld [vmem:[%s2618_s4 + $0x28] sm:$0xff]  ;;  %v1072_v25 = vld [vmem:[%s2618_s4 + $0x58] sm:$0xff] }
 0x37a   : > { %2096 = vpow2.f32 %v672_v27  ;;  %v806_v33 = vsub.f32 %v802_v18, %v805_v31  ;;  %v2007_v16 = vpack.c.bf16 %v1066_v15, %v1065_v14  ;;  %v1068_v18 = vld [vmem:[%s2618_s4 + $0x38] sm:$0xff]  ;;  %v2016_v27 = vpack.c.bf16 %v1072_v25, %v1071_v24  ;;  %v1446_v24 = vld [vmem:[%s2622_s8] sm:$0x1] }
 0x37b   : > { %v942_v34 = vmul.f32 1.442695, %v941_v32  ;;  %v2010_v19 = vpack.c.bf16 %v1068_v18, %v1067_v17  ;;  %v1530_v25 = vrot.slane %v1446_v24, %v2408_v53 }
 0x37c   : > { %v807_v35 = vmul.f32 1.442695, %v806_v33 }
 0x37d   : > { %2098 = vpow2.f32 %v942_v34  ;;  %v680_v45 = vpop.permute.xlu1 %679 }
 0x37e   : > { %2100 = vpow2.f32 %v807_v35 }
 0x383   : > { %v2095_v36 = vpop.eup %2094 }
 0x384   : > { %v2097_v37 = vpop.eup %2096  ;;  %v542_v38 = vsel %vm535_vm8, %v2095_v36, 0.0 }
 0x385   : > { %v674_v40 = vsel %vm535_vm8, %v2097_v37, 0.0  ;;  %543 = vadd.xlane.f32.xlu1 %v542_v38  ;;  %v2208_v38 = vmov 8  }
 0x386   : > { %675 = vadd.xlane.f32.xlu0 %v674_v40  ;;  %2092 = vset.pattern.permute.xlu1 %v2208_v38 }
 0x387   : > { %v2099_v41 = vpop.eup %2098 }
 0x388   : > { %v2101_v42 = vpop.eup %2100  ;;  %v944_v43 = vsel %vm535_vm8, %v2099_v41, 0.0 }
 0x389   : > { %v809_v44 = vsel %vm535_vm8, %v2101_v42, 0.0 }
 0x38a   : > { %810 = vadd.xlane.f32.xlu1 %v809_v44  ;;  %945 = vadd.xlane.f32.xlu0 %v944_v43 }
 0x39b   : > { %949 = vrot.lane.b32.xlu1 %v2392_v39, %s2203_s16 }
 0x3a0   : > { %814 = vrot.lane.b32.xlu0 %v2392_v39, %s2204_s17  ;;  %s2571_s17 = scalar_lea.hbm %s2623_s9, %s1817_s27 }
 0x412   : > { %v544_v46 = vpop.xlane.xlu1 %543 }
 0x413   : > { %2102 = vrcp.f32 %v544_v46  ;;  %v676_v48 = vpop.xlane.xlu0 %675 }
 0x414   : > { %2104 = vrcp.f32 %v676_v48 }
 0x417   : > { %v811_v49 = vpop.xlane.xlu1 %810  ;;  %v946_v51 = vpop.xlane.xlu0 %945 }
 0x418   : > { %2106 = vrcp.f32 %v811_v49 }
 0x419   : > { %2108 = vrcp.f32 %v946_v51 }
 0x41b   : > { %v815_v58 = vpop.permute.xlu0 %814  ;;  %v950_v61 = vpop.permute.xlu1 %949 }
 0x41d   : > { %v2103_v52 = vpop.eup %2102 }
 0x41e   : > { %v546_v54 = vmul.f32 %v2103_v52, %v2095_v36  ;;  %v2105_v55 = vpop.eup %2104 }
 0x41f   : > { %v678_v57 = vmul.f32 %v2105_v55, %v2097_v37  ;;  %v1073_v37 = vld [vmem:[%s2618_s4 + $0x60] sm:$0x1] }
 0x420   : > { %1902 = vmatmul.mubr.msk.f32.vlgmr.msra.gmra.mrb[0].mxu1 %vm535_vm8, %v546_v54 }
 0x421   : > { %1905 = vmatpush3.msra.mxu1 %v680_v45  ;;  %1906 = vmatprep.mubr.msk.f32.mxu1 %vm2191_vm1, %v2190_v23 }
 0x422   : > { %1909 = vmatprep.subr.mxu1 %v2190_v23  ;;  %v2107_v39 = vpop.eup %2106 }
 0x423   : > { %v813_v59 = vmul.f32 %v2107_v39, %v2101_v42  ;;  %v2109_v60 = vpop.eup %2108 }
 0x424   : > { %1907 = vmatmul.mubr.msk.f32.vlgmr.msra.gmra.mrb[2].mxu1 %vm535_vm8, %v678_v57  ;;  %v948_v62 = vmul.f32 %v2109_v60, %v2099_v41 }
 0x425   : > { %1910 = vmatpush3.msra.mxu1 %v815_v58  ;;  %1911 = vmatprep.mubr.msk.f32.mxu1 %vm2191_vm1, %v2190_v23 }
 0x426   : > { %1914 = vmatprep.subr.mxu1 %v2190_v23 }
 0x428   : > { %1912 = vmatmul.mubr.msk.f32.vlgmr.msra.gmra.mrb[4].mxu1 %vm535_vm8, %v813_v59 }
 0x429   : > { %1915 = vmatpush3.msra.mxu1 %v950_v61  ;;  %1916 = vmatprep.mubr.msk.f32.mxu1 %vm2191_vm1, %v2190_v23 }
 0x42a   : > { %2000 = vmatprep.subr.bf16.mxu1 %v2189_v7 }
 0x42c   : > { %1917 = vmatmul.mubr.msk.f32.vlgmr.msra.gmra.mrb[6].mxu1 %vm535_vm8, %v948_v62 }
 0x42d   : > { %1945 = vmatprep.mubr.msk.f32.mxu1 %vm2191_vm1, %v2190_v23  ;;  %2002 = vmatpush3.bf16.msra.mxu1 %v2001_v11 }
 0x42e   : > { %2003 = vmatprep.subr.bf16.mxu1 %v2189_v7 }
 0x431   : > { %2005 = vmatpush3.bf16.msra.mxu1 %v2004_v13 }
 0x432   : > { %2006 = vmatprep.subr.bf16.mxu1 %v2189_v7 }
 0x435   : > { %2008 = vmatpush3.bf16.msra.mxu1 %v2007_v16 }
 0x436   : > { %2009 = vmatprep.subr.bf16.mxu1 %v2189_v7 }
 0x439   : > { %2011 = vmatpush3.bf16.msra.mxu1 %v2010_v19 }
 0x43a   : > { %2012 = vmatprep.subr.bf16.mxu1 %v2189_v7 }
 0x43d   : > { %2014 = vmatpush3.bf16.msra.mxu1 %v2013_v22  ;;  %v2019_v22 = vpack.c.bf16 %v1524_v21, %v1523_v20 }
 0x43e   : > { %2015 = vmatprep.subr.bf16.mxu1 %v2189_v7 }
 0x441   : > { %2017 = vmatpush3.bf16.msra.mxu1 %v2016_v27  ;;  %v1525_v27 = vld [vmem:[%s2620_s6 + $0x10] sm:$0xff] }
 0x442   : > { %1943 = vmatprep.subr.mxu1 %v2190_v23 }
 0x445   : > { %1944 = vmatpush3.msk.msra.mxu1 %vm411_vm0, %v1073_v37  ;;  %vm1293_vm0 = vcmp.eq.s32.totalorder %v1289_v8, %v1292_v9 }
 0x446   : > { %2018 = vmatprep.subr.bf16.mxu1 %v2189_v7  ;;  %v1810_v13 = vsel %vm1293_vm0, 1.0, %v2190_v23 }
 0x4f3   : > { %v616_v63 = vpop.f32.mrb[0].mxu1 }
 0x4f4   : > { %v1903_v0 = vpop.f32.mrb[1].mxu1 }
 0x4f7   : > { %v751_v1 = vpop.f32.mrb[2].mxu1 }
 0x4f8   : > { %1026 = vrot.lane.b32.xlu1 %v751_v1, %s2205_s24  ;;  %v1908_v2 = vpop.f32.mrb[3].mxu1 }
 0x4fb   : > { %v886_v3 = vpop.f32.mrb[4].mxu1 }
 0x4fc   : > { %1030 = vrot.lane.b32.xlu0 %v886_v3, %s2206_s25  ;;  %v1913_v4 = vpop.f32.mrb[5].mxu1 }
 0x4ff   : > { %v1021_v5 = vpop.f32.mrb[6].mxu1 }
 0x500   : > { %1034 = vrot.lane.b32.xlu1 %v1021_v5, %s2207_s26  ;;  %v1918_v6 = vpop.f32.mrb[7].mxu1  ;;  %s2210_s26 = smov 96  }
 0x56a   : > { %v1027_v29 = vpop.permute.xlu1 %1026 }
 0x56b   : > { %v1037_v32 = vsel %vm535_vm8, %v616_v63, %v1027_v29 }
 0x56e   : > { %v1031_v31 = vpop.permute.xlu0 %1030 }
 0x56f   : > { %v1039_v33 = vsel %vm1038_vm12, %v1037_v32, %v1031_v31 }
 0x572   : > { %v1035_v34 = vpop.permute.xlu1 %1034 }
 0x573   : > { %v1041_v35 = vsel %vm1040_vm13, %v1039_v33, %v1035_v34  ;;  %v1608_v34 = vld [vmem:[%s2621_s7] sm:$0xff] }
 0x574   : > { %v1043_v36 = vmul.f32 1.442695, %v1041_v35  ;;  %vm1042_vm14 = vcmp.gt.f32.partialorder %v1041_v35, 0.0 }
 0x576   : > { %2110 = vpow2.f32 %v1043_v36 }
 0x580   : > { %v2111_v40 = vpop.eup %2110 }
 0x581   : > { %v1805_v41 = vadd.f32 -1.0, %v2111_v40 }
 0x583   : > { %v1046_v42 = vsel %vm1042_vm14, %v1041_v35, %v1805_v41 }
 0x584   : > { %v1049_v43 = vmul.f32 %v1046_v42, %v2379_v28  ;;  %v1048_v44 = vmul.f32 %v1046_v42, %v2375_v26  ;;  %v1047_v45 = vmul.f32 %v1046_v42, %v2383_v30 }
 0x586   : > { %1055 = vrot.lane.b32.xlu1 %v1049_v43, %s2193_s23  ;;  %1051 = vrot.lane.b32.xlu0 %v1048_v44, %s2192_s21  ;;  %s2209_s23 = smov 119  }
 0x5f8   : > { %v1056_v46 = vpop.permute.xlu1 %1055  ;;  %v1052_v48 = vpop.permute.xlu0 %1051 }
 0x5f9   : > { %v1058_v49 = vsel %vm388_vm2, %v1047_v45, %v1052_v48 }
 0x5fa   : > { %v1059_v7 = vsel %vm390_vm3, %v1058_v49, %v1056_v46  ;;  %vm1297_vm3 = vcmp.eq.s32.totalorder %v1289_v8, %v1296_v10 }
 0x5fb   : > { %v1060_v51 = vsel %vm392_vm4, %v1059_v7, 1.0  ;;  %v1811_v47 = vsel %vm1297_vm3, 1.0, %v2190_v23 }
 0x5fc   : > { %1946 = vmatmul.mubr.msk.f32.vlgmr.msra.gmra.mrb[8].mxu1 %vm407_vm5, %v1060_v51 }
 0x5fd   : > { %1974 = vmatprep.mubr.msk.f32.mxu1 %vm2191_vm1, %v2190_v23  ;;  %2020 = vmatpush3.bf16.msra.mxu1 %v2019_v22 }
 0x5fe   : > { %1972 = vmatprep.subr.mxu1 %v2190_v23 }
 0x601   : > { %1973 = vmatpush3.msra.mxu1 %v1525_v27 }
 0x6cf   : > { %v1146_v26 = vpop.f32.mrb[8].mxu1 }
 0x6d0   : > { %1187 = vperm.xlu1 %2092, %v1146_v26   ;;  %1151 = vrot.lane.b32.xlu0 %v1146_v26, %s2209_s23  ;;  %v1947_v28 = vpop.f32.mrb[9].mxu1  ;;  %s2126_s23 = sshll.u32 %s2211_s13, 4  ;;  %s2127_s23 = int_to_ptr.vmem [resolvable:$false] %s2126_s23 }
 0x6d1   : > { %1949 = vmatpush3.msra.mxu0 %v1146_v26  ;;  %s2128_s21 = scalar_lea.vmem %s2127_s23, 32 }
 0x6d2   : > { %1953 = vmatprep.subr.mxu0 %v2190_v23 }
 0x742   : > { %v1152_v30 = vpop.permute.xlu0 %1151 }
 0x743   : > { %1154 = vxpose.xlu0.b32.start.end [1/1] (short) (narrow) %v1152_v30, 8 }
 0x74f   : > { %v1188_v55 = vpop.permute.xlu1 %1187 }
 0x76c   : > { %2093 = vset.pattern.permute.xlu0 %v2208_v38 }
 0x7c3   : > { %v1170_v52 = vpop.trf.xlu0 }
 0x7c4   : > { %v1193_v54 = vrot.slane %v1170_v52, %v2408_v53 }
 0x7c6   : > { %v1194_v57 = vadd.f32 %v1193_v54, %v1188_v55 }
 0x7c8   : > { %vm1195_vm15 = vcmp.ge.f32.partialorder %v1194_v57, 0.0  ;;  %v1196_v39 = vmul.f32 0.2, %v1194_v57 }
 0x7ca   : > { %v1197_v58 = vsel %vm1195_vm15, %v1194_v57, %v1196_v39 }
 0x7cb   : > { %v1198_v59 = vsel %vm533_vm6, %v1197_v58, -1e+30 }
 0x7cc   : > { %v1199_v60 = vsel %vm535_vm8, %v1198_v59, -inf }
 0x7cd   : > { %1200 = vmax.xlane.f32.xlu1 %v1199_v60 }
 0x7de   : > { %1531 = vrot.lane.b32.xlu1 %v1530_v25, %s2203_s16  ;;  %s347_s16 = sand.u32 1, %s2176_s10  }
 0x7df   : > { %s348_s28 = scalar_lea.vmem [#allocation2], %s347_s16  ;;  %s1701_s24 = scalar_lea.sflag [#allocation3], %s347_s16 }
 0x7e0   : > { %s1713_s29 = sshll.u32 %s348_s28, 4  ;;  %s2573_s29 = int_to_ptr.vmem [resolvable:$true] %s1713_s29 }
 0x7e1   : > { %s2122_s25 = scalar_lea.vmem %s2573_s29, 16  ;;  %p2129_p0 = scmp.lt.s32.totalorder %s2573_s29, %s2127_s23 }
 0x7e2   : > { %1609 = vrot.lane.b32.xlu1 %v1530_v25, %s2210_s26  ;;  %p2123_p11 = scmp.ne.s32.totalorder %s2573_s29, %s2122_s25  ;;  %p2130_p1 = scmp.lt.s32.totalorder %s2128_s21, %s2122_s25 }
 0x7e4   : > { %p2124_p12 = pnand %p2123_p11, %p2300_p5  ;;  %p2131_p2 = por %p2130_p1, %p2129_p0 }
 0x7e6   : > { %p2125_p13 = pneg %p2124_p12 }
 0x7e8   : > { %p2132_p3 = pnand %p2131_p2, %p2125_p13 }
 0x85a   : > { %v1201_v61 = vpop.xlane.xlu1 %1200 }
 0x85b   : > { %v1202_v62 = vsub.f32 %v1198_v59, %v1201_v61 }
 0x85d   : > { %v1203_v63 = vmul.f32 1.442695, %v1202_v62 }
 0x85f   : > { %2112 = vpow2.f32 %v1203_v63 }
 0x869   : > { %v2113_v0 = vpop.eup %2112 }
 0x86a   : > { %v1205_v1 = vsel %vm535_vm8, %v2113_v0, 0.0 }
 0x86b   : > { %1206 = vadd.xlane.f32.xlu0 %v1205_v1 }
 0x8f8   : > { %v1207_v2 = vpop.xlane.xlu0 %1206 }
 0x8f9   : > { %2114 = vrcp.f32 %v1207_v2 }
 0x903   : > { %v2115_v3 = vpop.eup %2114 }
 0x904   : > { %v1209_v4 = vmul.f32 %v2115_v3, %v2113_v0 }
 0x906   : > { %1951 = vmatmul.mubr.msk.f32.vlgmr.msra.gmra.mrb[2].mxu0 %vm535_vm8, %v1209_v4 }
 0x907   : > { %1955 = vmatprep.mubr.msk.f32.mxu0 %vm2191_vm1, %v2190_v23 }
 0x9d9   : > { %v1279_v56 = vpop.f32.mrb[2].mxu0 }
 0x9da   : > { %v1284_v5 = vmul.f32 1.442695, %v1279_v56  ;;  %v1952_v6 = vpop.f32.mrb[3].mxu0  ;;  %vm1283_vm2 = vcmp.gt.f32.partialorder %v1279_v56, 0.0 }
 0x9dc   : > { %2116 = vpow2.f32 %v1284_v5 }
 0x9e6   : > { %v2117_v11 = vpop.eup %2116 }
 0x9e7   : > { %v1809_v12 = vadd.f32 -1.0, %v2117_v11 }
 0x9e9   : > { %v1287_v14 = vsel %vm1283_vm2, %v1279_v56, %v1809_v12 }
 0x9ea   : > { %1954 = vmatpush3.msra.mxu0 %v1287_v14 }
 0x9eb   : > { %1956 = vmatmul.mubr.msk.f32.vlgmr.msra.gmra.mrb[4].mxu0 %vm535_vm8, %v1810_v13  ;;  %1958 = vmatprep.subr.mxu0 %v2190_v23 }
 0x9ec   : > { %1959 = vmatpush3.msra.mxu0 %v1287_v14  ;;  %1960 = vmatprep.mubr.msk.f32.mxu0 %vm2191_vm1, %v2190_v23 }
 0x9ed   : > { %1963 = vmatprep.subr.mxu0 %v2190_v23 }
 0x9ef   : > { %1961 = vmatmul.mubr.msk.f32.vlgmr.msra.gmra.mrb[6].mxu0 %vm535_vm8, %v1811_v47 }
 0x9f0   : > { %1965 = vmatprep.mubr.msk.f32.mxu0 %vm2191_vm1, %v2190_v23  ;;  %1964 = vmatpush3.msra.mxu0 %v1448_v50 }
 0x9f1   : > { %1977 = vmatprep.subr.mxu0 %v2190_v23 }
 0xabe   : > { %v1369_v15 = vpop.f32.mrb[4].mxu0 }
 0xabf   : > { %v1957_v16 = vpop.f32.mrb[5].mxu0 }
 0xac2   : > { %v1442_v17 = vpop.f32.mrb[6].mxu0 }
 0xac3   : > { %v1447_v18 = vmul.f32 %v1442_v17, %v1369_v15  ;;  %v1962_v19 = vpop.f32.mrb[7].mxu0 }
 0xac5   : > { %1966 = vmatmul.mubr.msk.f32.vlgmr.msra.gmra.mrb[8].mxu0 %vm535_vm8, %v1447_v18 }
 0xac6   : > { %1979 = vmatprep.mubr.msk.f32.mxu0 %vm2191_vm1, %v2190_v23  ;;  %1978 = vmatpush3.msra.mxu0 %v1608_v34  ;;  %v1532_v23 = vpop.permute.xlu1 %1531  ;;  %vm1685_vm1 = vcmask 8192  }
 0xaca   : > { %v1610_v38 = vpop.permute.xlu1 %1609 }
 0xb98   : > { %v1518_v29 = vpop.f32.mrb[8].mxu0 }
 0xb99   : > { %v1519_v31 = vadd.f32 %v1518_v29, %v1446_v24  ;;  %v1967_v32 = vpop.f32.mrb[9].mxu0 }
 0xb9b   : > { %v1522_v33 = vmax.f32 %v1519_v31, 0.0 }
 0xb9d   : > { %1975 = vmatmul.mubr.msk.f32.vlgmr.msra.gmra.mrb[10].mxu1 %vm1040_vm13, %v1522_v33 }
 0xc70   : > { %v1603_v53 = vpop.f32.mrb[10].mxu1 }
 0xc71   : > { %v1604_v35 = vadd.f32 %v1603_v53, %v1532_v23  ;;  %v1976_v36 = vpop.f32.mrb[11].mxu1 }
 0xc73   : > { %v1607_v37 = vmax.f32 %v1604_v35, 0.0 }
 0xc75   : > { %1980 = vmatmul.mubr.msk.f32.vlgmr.msra.gmra.mrb[10].mxu0 %vm535_vm8, %v1607_v37 }
 0xd48   : > { %v1681_v40 = vpop.f32.mrb[10].mxu0 }
 0xd49   : > { %v1682_v41 = vadd.f32 %v1681_v40, %v1610_v38  ;;  %v1981_v42 = vpop.f32.mrb[11].mxu0 }
 0xd4b   : > { %v1686_v43 = vsel %vm1685_vm1, %v1682_v41, -inf }
 0xd4c   : > { %1687 = vmax.xlane.f32.xlu1 %v1686_v43 }
 0xdd9   : > { %v1688_v44 = vpop.xlane.xlu1 %1687 }
 0xdda   : > { %v1689_v45 = vsub.f32 %v1682_v41, %v1688_v44 }
 0xddc   : > { %v1690_v46 = vmul.f32 1.442695, %v1689_v45 }
 0xdde   : > { %2118 = vpow2.f32 %v1690_v46 }
 0xde8   : > { %v2119_v48 = vpop.eup %2118 }
 0xde9   : > { %v1692_v49 = vsel %vm1685_vm1, %v2119_v48, 0.0 }
 0xdea   : > { %1693 = vadd.xlane.f32.xlu0 %v1692_v49 }
 0xe77   : > { %v1694_v7 = vpop.xlane.xlu0 %1693 }
 0xe78   : > { %2120 = vlog2.f32 %v1694_v7 }
 0xe82   : > { %v2121_v51 = vpop.eup %2120 }
 0xe83   : > { %v1696_v26 = vmul.f32 0.6931472, %v2121_v51 }
 0xe85   : > { %v1697_v28 = vadd.f32 %v1696_v26, %v1688_v44 }
 0xe87   : > { %v1698_v30 = vsub.f32 %v1682_v41, %v1697_v28 }
 0xe89   : > { %1699 = vst.msk [vmem:[%s348_s28] sm:$0x1] %vm1685_vm1, %v1698_v30 }
 0xe8a   : > { %2135 = shalt.err (!%p2132_p3)
}
 0xe8b   : > { %s2136_s26 = scalar_lea.hbm %s2571_s17, 16  ;;  %s2140_s28 = scalar_lea.hbm %s2623_s9, 32 }
 0xe8c   : > { %p2137_p4 = scmp.ne.s32.totalorder %s2571_s17, %s2136_s26  ;;  %p2141_p9 = scmp.lt.u32.totalorder %s2571_s17, %s2623_s9 }
 0xe8d   : > { %p2142_p10 = scmp.lt.u32.totalorder %s2140_s28, %s2136_s26  ;;  %p2144_p12 = scmp.lt.u32.totalorder %s2136_s26, %s2571_s17 }
 0xe8e   : > { %p2138_p7 = pnand %p2137_p4, %p2300_p5 }
 0xe8f   : > { %p2143_p11 = por %p2142_p10, %p2141_p9 }
 0xe90   : > { %p2139_p8 = pneg %p2138_p7 }
 0xe91   : > { %p2145_p13 = por %p2144_p12, %p2143_p11 }
 0xe93   : > { %p2146_p0 = pnand %p2145_p13, %p2139_p8 }
 0xe95   : > { %2149 = shalt.err (!%p2146_p0)
}
 0xe96   : > { %2021 = dma.vmem_to_hbm [thread:$0]  (%p2300_p5), %s2573_s29, 16, %s2571_s17, %s1701_s24  }
 0xe97 PF: > { %p2027_p1 = scmp.ge.s32.totalorder %s2184_s12, 2  ;;  %s1725_s25 = sand.u32 1, %s2172_s30  }
 0xe98   : > { %s1726_s13 = scalar_lea.sflag [#allocation3], %s1725_s25 }
 0xe99   : > { %p2024_p2 = pnand %p2027_p1, %p2304_p6 }
 0xe9b   : > { %2167 = dma.done.wait (!%p2024_p2), %s1726_s13, 16  }
 0xe9c   : > { %2169 = vsyncadd (!%p2024_p2), %s1726_s13, 4294967280  ;;  %p19_p3 = scmp.ge.s32.totalorder %s2287_s15, 4   ;;  %s2626_s30 = smov %s2176_s10 }
 0xe9d   : > { %s2627_s10 = smov %s2180_s11  ;;  %s2628_s11 = smov %s2298_s18 }
 0xe9e   : > { %s2629_s12 = smov %s2287_s15  ;;  %21 = sbr.rel (!%p19_p3) target bundleno = 3 (0x3), region = 97 }
 0xea5   :  { %1730 = vsyncpa [#allocation3], 1 }
 0xea6   :  { %1732 = vsyncpa [#allocation3 + $0x1], 1 }

</bundles_post_ra>
